<compile_context>
chip_gen: v7x
topology: tpu7x:2x2x1
jax: 0.10.0
libtpu: 0.0.40
codegen_flags: <defaults>
</compile_context>

<pallas_src>
import jax
import jax.numpy as jnp
from jax import lax
from jax.experimental import pallas as pl
from jax.experimental.pallas import tpu as pltpu


# ----------------------------- config (small) ------------------------------
B = 2          # batch
LQ = 8         # decoder (query) sequence length
LK = 8         # encoder (key/value) sequence length
D_MODEL = 32   # config.d_model
N_HEADS = 4    # config.num_heads
D_KV = 8       # config.d_kv
INNER = N_HEADS * D_KV          # 32
EPS = 1e-6     # config.layer_norm_epsilon

R_Q = B * LQ                    # flattened query rows   (16)
R_K = B * LK                    # flattened key/val rows (16)

# Batch of a flattened row is row >> log2(L); head of a lane is lane >> log2(d_kv).
assert LQ & (LQ - 1) == 0 and LK & (LK - 1) == 0 and D_KV & (D_KV - 1) == 0
assert R_Q & (R_Q - 1) == 0
_LQ_SHIFT = LQ.bit_length() - 1
_LK_SHIFT = LK.bit_length() - 1
_DKV_SHIFT = D_KV.bit_length() - 1


def _cross_attn_kernel(h_ref, kv_ref, lnw_ref, wqkv_ref, wo_ref, out_ref):
    # Whole problem (~10 KiB) in a single invocation; everything lives in VMEM.
    x = h_ref[...].astype(jnp.float32)        # (R_Q, D_MODEL)
    enc = kv_ref[...].astype(jnp.float32)     # (R_K, D_MODEL)
    ln_w = lnw_ref[...].astype(jnp.float32)   # (1,   D_MODEL)

    # --- T5LayerNorm: RMS norm, no mean subtraction (f32 math) ---
    var = jnp.mean(x * x, axis=-1, keepdims=True)
    normed = ln_w * (x * lax.rsqrt(var + EPS))

    # --- fused Q/K/V projection: ONE MXU pass, bf16 inputs / f32 accumulate ---
    lhs = jnp.concatenate([normed, enc], axis=0).astype(jnp.bfloat16)       # (R_Q+R_K, D_MODEL)
    qkv = jnp.dot(lhs, wqkv_ref[...], preferred_element_type=jnp.float32)   # (32, 3*INNER)
    q = qkv[:R_Q, 0:INNER]                  # queries come from the normed rows
    k = qkv[R_Q:, INNER:2 * INNER]          # keys    come from the encoder rows
    v = qkv[R_Q:, 2 * INNER:3 * INNER]      # values  come from the encoder rows

    # --- per-head lane masks; stack heads along ROWS with a broadcast multiply
    #     (no 8-lane, lane-offset extracts of q/k/v). ---
    lane = lax.broadcasted_iota(jnp.int32, (N_HEADS, 1, INNER), 2)
    head = lax.broadcasted_iota(jnp.int32, (N_HEADS, 1, INNER), 0)
    head_mask = ((lane >> _DKV_SHIFT) == head).astype(jnp.float32)          # (H,1,INNER)
    q_stk = (q[None, :, :] * head_mask).reshape(N_HEADS * R_Q, INNER)       # (H*R_Q, INNER)
    v_stk = (v[None, :, :] * head_mask).reshape(N_HEADS * R_K, INNER)       # (H*R_K, INNER)

    # --- scores for ALL heads in one dot: (H*R_Q, INNER) x (R_K, INNER)^T ---
    s = lax.dot_general(q_stk.astype(jnp.bfloat16), k.astype(jnp.bfloat16),
                        (((1,), (1,)), ((), ())),
                        preferred_element_type=jnp.float32)                 # (H*R_Q, R_K)

    # --- block-diagonal batch mask: each flattened query row attends only to
    #     keys of its own batch (the T5 position bias itself is zero here). ---
    row = lax.broadcasted_iota(jnp.int32, (N_HEADS * R_Q, R_K), 0)
    col = lax.broadcasted_iota(jnp.int32, (N_HEADS * R_Q, R_K), 1)
    same_batch = ((row & (R_Q - 1)) >> _LQ_SHIFT) == (col >> _LK_SHIFT)

    # --- single softmax over the stacked (heads x queries) scores, f32 math,
    #     mask applied as a select (not a -1e30 add through exp). ---
    m = jnp.max(jnp.where(same_batch, s, -jnp.inf), axis=-1, keepdims=True)
    p = jnp.where(same_batch, jnp.exp(s - m), 0.0)
    p = p * pl.reciprocal(jnp.sum(p, axis=-1, keepdims=True), approx=True)

    # --- fold V straight through the output projection (one dot): row block h
    #     of vo equals v_h @ Wo[h*D_KV:(h+1)*D_KV, :] because of the head mask. ---
    vo = jnp.dot(v_stk.astype(jnp.bfloat16), wo_ref[...],
                 preferred_element_type=jnp.float32)                        # (H*R_K, D_MODEL)

    # --- per-head (P @ VO) as one batched einsum, reduce heads, add residual ---
    p3 = p.reshape(N_HEADS, R_Q, R_K).astype(jnp.bfloat16)
    vo3 = vo.reshape(N_HEADS, R_K, D_MODEL).astype(jnp.bfloat16)
    ctx = jnp.einsum("hqk,hkd->hqd", p3, vo3,
                     preferred_element_type=jnp.float32)                    # (H, R_Q, D_MODEL)
    out_ref[...] = (x + jnp.sum(ctx, axis=0)).astype(out_ref.dtype)


def prepare_params(ln_w, wq_t, wk_t, wv_t, wo_t):
    """One-time (init-time) parameter prep: fuse [Wq|Wk|Wv] and cast weights to
    bf16 so no per-call pad/concat/cast XLA ops are needed. Weights are given
    pre-transposed to (in_features, out_features)."""
    wqkv = jnp.concatenate([wq_t, wk_t, wv_t], axis=1).astype(jnp.bfloat16)  # (D_MODEL, 3*INNER)
    wo = wo_t.astype(jnp.bfloat16)                                           # (INNER, D_MODEL)
    lnw = ln_w.astype(jnp.float32).reshape(1, D_MODEL)
    return lnw, wqkv, wo


@jax.jit
def t5_layer_cross_attention(hidden, kv, lnw, wqkv, wo):
    """hidden: (B, LQ, D_MODEL) decoder states; kv: (B, LK, D_MODEL) encoder states."""
    vmem = pl.BlockSpec(memory_space=pltpu.MemorySpace.VMEM)
    out = pl.pallas_call(
        _cross_attn_kernel,
        out_shape=jax.ShapeDtypeStruct((R_Q, D_MODEL), hidden.dtype),
        in_specs=[vmem, vmem, vmem, vmem, vmem],
        out_specs=vmem,
        # Single invocation, no grid / pipelining: the whole problem fits VMEM
        # with huge headroom on v5e/v6e/v7x.
        # TODO(synk): add a "parallel" row-tile grid axis if scaled to real T5
        # sizes (needed to use both TensorCores on v7x and to pipeline HBM).
    )(hidden.reshape(R_Q, D_MODEL), kv.reshape(R_K, D_MODEL), lnw, wqkv, wo)
    return out.reshape(B, LQ, D_MODEL)


def _reference(hidden, kv, ln_w, wq_t, wk_t, wv_t, wo_t):
    # Pure-JAX f32 reference mirroring the PyTorch module for verification.
    x = hidden.astype(jnp.float32)
    var = jnp.mean(x * x, axis=-1, keepdims=True)
    normed = ln_w * (x * lax.rsqrt(var + EPS))
    q = normed @ wq_t
    k = kv @ wk_t
    v = kv @ wv_t
    qh = q.reshape(B, LQ, N_HEADS, D_KV).transpose(0, 2, 1, 3)
    kh = k.reshape(B, LK, N_HEADS, D_KV).transpose(0, 2, 1, 3)
    vh = v.reshape(B, LK, N_HEADS, D_KV).transpose(0, 2, 1, 3)
    s = jnp.einsum("bhqd,bhkd->bhqk", qh, kh)
    p = jax.nn.softmax(s, axis=-1)
    ctx = jnp.einsum("bhqk,bhkd->bhqd", p, vh)
    ctx = ctx.transpose(0, 2, 1, 3).reshape(B, LQ, INNER)
    return hidden + ctx @ wo_t


if __name__ == "__main__":
    key = jax.random.PRNGKey(0)
    ks = jax.random.split(key, 7)
    hidden = jax.random.normal(ks[0], (B, LQ, D_MODEL), jnp.float32)
    kv = jax.random.normal(ks[1], (B, LK, D_MODEL), jnp.float32)
    ln_w = jnp.ones((D_MODEL,), jnp.float32)  # T5LayerNorm init: ones
    scale = 0.05
    # nn.Linear weights are (out, in); store transposed (in, out) for x @ W.
    wq_t = scale * jax.random.normal(ks[2], (D_MODEL, INNER), jnp.float32)
    wk_t = scale * jax.random.normal(ks[3], (D_MODEL, INNER), jnp.float32)
    wv_t = scale * jax.random.normal(ks[4], (D_MODEL, INNER), jnp.float32)
    wo_t = scale * jax.random.normal(ks[5], (INNER, D_MODEL), jnp.float32)

    lnw, wqkv, wo = prepare_params(ln_w, wq_t, wk_t, wv_t, wo_t)
    out = t5_layer_cross_attention(hidden, kv, lnw, wqkv, wo)
    out = jax.block_until_ready(out)

    ref = _reference(hidden, kv, ln_w, wq_t, wk_t, wv_t, wo_t)
    # Tolerance covers bf16 MXU inputs (f32 accumulation) + approx reciprocal.
    assert jnp.allclose(out, ref, atol=1e-2, rtol=1e-2), "mismatch vs reference"
    print("KERNEL_OK")
</pallas_src>

<mosaic_0001>
module attributes {stable_mosaic.version = 11 : i64} {
  func.func @_cross_attn_kernel(%arg0: memref<16x32xf32, #tpu.memory_space<vmem>>, %arg1: memref<16x32xf32, #tpu.memory_space<vmem>>, %arg2: memref<1x32xf32, #tpu.memory_space<vmem>>, %arg3: memref<32x96xbf16, #tpu.memory_space<vmem>>, %arg4: memref<32x32xbf16, #tpu.memory_space<vmem>>, %arg5: memref<16x32xf32, #tpu.memory_space<vmem>>) attributes {dimension_semantics = [], scalar_prefetch = 0 : i64, scratch_operands = 0 : i64, tpu.core_type = #tpu.core_type<tc>} {
    %c0 = arith.constant 0 : index
    %c0_0 = arith.constant 0 : index
    %0 = vector.load %arg0[%c0, %c0_0] : memref<16x32xf32, #tpu.memory_space<vmem>>, vector<16x32xf32>
    %c0_1 = arith.constant 0 : index
    %c0_2 = arith.constant 0 : index
    %1 = vector.load %arg1[%c0_1, %c0_2] : memref<16x32xf32, #tpu.memory_space<vmem>>, vector<16x32xf32>
    %c0_3 = arith.constant 0 : index
    %c0_4 = arith.constant 0 : index
    %2 = vector.load %arg2[%c0_3, %c0_4] : memref<1x32xf32, #tpu.memory_space<vmem>>, vector<1x32xf32>
    %3 = arith.mulf %0, %0 : vector<16x32xf32>
    %cst = arith.constant dense<0.000000e+00> : vector<16xf32>
    %4 = vector.multi_reduction <add>, %3, %cst [1] : vector<16x32xf32> to vector<16xf32>
    %5 = vector.shape_cast %4 : vector<16xf32> to vector<16x1xf32>
    %cst_5 = arith.constant 3.200000e+01 : f32
    %6 = vector.broadcast %cst_5 : f32 to vector<16x1xf32>
    %7 = arith.divf %5, %6 : vector<16x1xf32>
    %cst_6 = arith.constant 9.99999997E-7 : f32
    %8 = vector.broadcast %cst_6 : f32 to vector<16x1xf32>
    %9 = arith.addf %7, %8 : vector<16x1xf32>
    %10 = math.rsqrt %9 : vector<16x1xf32>
    %11 = vector.broadcast %10 : vector<16x1xf32> to vector<16x32xf32>
    %12 = arith.mulf %0, %11 : vector<16x32xf32>
    %13 = vector.broadcast %2 : vector<1x32xf32> to vector<16x32xf32>
    %14 = arith.mulf %13, %12 : vector<16x32xf32>
    %15 = tpu.concatenate %14, %1 in 0 : vector<16x32xf32>, vector<16x32xf32> -> vector<32x32xf32>
    %16 = arith.truncf %15 : vector<32x32xf32> to vector<32x32xbf16>
    %c0_7 = arith.constant 0 : index
    %c0_8 = arith.constant 0 : index
    %17 = vector.load %arg3[%c0_7, %c0_8] : memref<32x96xbf16, #tpu.memory_space<vmem>>, vector<32x96xbf16>
    %cst_9 = arith.constant dense<0.000000e+00> : vector<32x96xf32>
    %18 = tpu.matmul %16, %17, %cst_9 {dimension_numbers = #tpu.dot_dimension_numbers<[1], [0], [0], [1], [0, 0, 1, 1], [], []>} : vector<32x32xbf16>, vector<32x96xbf16>, vector<32x96xf32> -> vector<32x96xf32>
    %19 = vector.extract_strided_slice %18 {offsets = [0, 0], sizes = [16, 32], strides = [1, 1]} : vector<32x96xf32> to vector<16x32xf32>
    %20 = vector.extract_strided_slice %18 {offsets = [16, 32], sizes = [16, 32], strides = [1, 1]} : vector<32x96xf32> to vector<16x32xf32>
    %21 = vector.extract_strided_slice %18 {offsets = [16, 64], sizes = [16, 32], strides = [1, 1]} : vector<32x96xf32> to vector<16x32xf32>
    %22 = tpu.iota {dimensions = array<i32: 2>} : vector<4x1x32xi32>
    %23 = tpu.iota {dimensions = array<i32: 0>} : vector<4x1x32xi32>
    %c3_i32 = arith.constant 3 : i32
    %24 = vector.broadcast %c3_i32 : i32 to vector<4x1x32xi32>
    %25 = arith.shrsi %22, %24 : vector<4x1x32xi32>
    %26 = arith.cmpi eq, %25, %23 : vector<4x1x32xi32>
    %27 = arith.extui %26 : vector<4x1x32xi1> to vector<4x1x32xi32>
    %28 = arith.sitofp %27 : vector<4x1x32xi32> to vector<4x1x32xf32>
    %29 = vector.shape_cast %19 : vector<16x32xf32> to vector<1x16x32xf32>
    %30 = vector.broadcast %29 : vector<1x16x32xf32> to vector<4x16x32xf32>
    %31 = vector.broadcast %28 : vector<4x1x32xf32> to vector<4x16x32xf32>
    %32 = arith.mulf %30, %31 : vector<4x16x32xf32>
    %33 = vector.shape_cast %32 : vector<4x16x32xf32> to vector<64x32xf32>
    %34 = vector.shape_cast %21 : vector<16x32xf32> to vector<1x16x32xf32>
    %35 = vector.broadcast %34 : vector<1x16x32xf32> to vector<4x16x32xf32>
    %36 = vector.broadcast %28 : vector<4x1x32xf32> to vector<4x16x32xf32>
    %37 = arith.mulf %35, %36 : vector<4x16x32xf32>
    %38 = vector.shape_cast %37 : vector<4x16x32xf32> to vector<64x32xf32>
    %39 = arith.truncf %33 : vector<64x32xf32> to vector<64x32xbf16>
    %40 = arith.truncf %20 : vector<16x32xf32> to vector<16x32xbf16>
    %cst_10 = arith.constant dense<0.000000e+00> : vector<64x16xf32>
    %41 = tpu.matmul %39, %40, %cst_10 {dimension_numbers = #tpu.dot_dimension_numbers<[1], [1], [0], [0], [0, 0, 1, 0], [], []>} : vector<64x32xbf16>, vector<16x32xbf16>, vector<64x16xf32> -> vector<64x16xf32>
    %42 = tpu.iota {dimensions = array<i32: 0>} : vector<64x16xi32>
    %43 = tpu.iota {dimensions = array<i32: 1>} : vector<64x16xi32>
    %c15_i32 = arith.constant 15 : i32
    %44 = vector.broadcast %c15_i32 : i32 to vector<64x16xi32>
    %45 = arith.andi %42, %44 : vector<64x16xi32>
    %c3_i32_11 = arith.constant 3 : i32
    %46 = vector.broadcast %c3_i32_11 : i32 to vector<64x16xi32>
    %47 = arith.shrsi %45, %46 : vector<64x16xi32>
    %c3_i32_12 = arith.constant 3 : i32
    %48 = vector.broadcast %c3_i32_12 : i32 to vector<64x16xi32>
    %49 = arith.shrsi %43, %48 : vector<64x16xi32>
    %50 = arith.cmpi eq, %47, %49 : vector<64x16xi32>
    %cst_13 = arith.constant 0xFF800000 : f32
    %51 = vector.broadcast %cst_13 : f32 to vector<64x16xf32>
    %52 = arith.select %50, %41, %51 : vector<64x16xi1>, vector<64x16xf32>
    %cst_14 = arith.constant dense<0xFF800000> : vector<64xf32>
    %53 = vector.multi_reduction <maximumf>, %52, %cst_14 [1] : vector<64x16xf32> to vector<64xf32>
    %54 = vector.shape_cast %53 : vector<64xf32> to vector<64x1xf32>
    %55 = vector.broadcast %54 : vector<64x1xf32> to vector<64x16xf32>
    %56 = arith.subf %41, %55 : vector<64x16xf32>
    %57 = math.exp %56 : vector<64x16xf32>
    %cst_15 = arith.constant 0.000000e+00 : f32
    %58 = vector.broadcast %cst_15 : f32 to vector<64x16xf32>
    %59 = arith.select %50, %57, %58 : vector<64x16xi1>, vector<64x16xf32>
    %cst_16 = arith.constant dense<0.000000e+00> : vector<64xf32>
    %60 = vector.multi_reduction <add>, %59, %cst_16 [1] : vector<64x16xf32> to vector<64xf32>
    %61 = vector.shape_cast %60 : vector<64xf32> to vector<64x1xf32>
    %62 = tpu.reciprocal %61 {approx = true} : vector<64x1xf32> -> vector<64x1xf32>
    %63 = vector.broadcast %62 : vector<64x1xf32> to vector<64x16xf32>
    %64 = arith.mulf %59, %63 : vector<64x16xf32>
    %65 = arith.truncf %38 : vector<64x32xf32> to vector<64x32xbf16>
    %c0_17 = arith.constant 0 : index
    %c0_18 = arith.constant 0 : index
    %66 = vector.load %arg4[%c0_17, %c0_18] : memref<32x32xbf16, #tpu.memory_space<vmem>>, vector<32x32xbf16>
    %cst_19 = arith.constant dense<0.000000e+00> : vector<64x32xf32>
    %67 = tpu.matmul %65, %66, %cst_19 {dimension_numbers = #tpu.dot_dimension_numbers<[1], [0], [0], [1], [0, 0, 1, 1], [], []>} : vector<64x32xbf16>, vector<32x32xbf16>, vector<64x32xf32> -> vector<64x32xf32>
    %68 = vector.shape_cast %64 : vector<64x16xf32> to vector<4x16x16xf32>
    %69 = arith.truncf %68 : vector<4x16x16xf32> to vector<4x16x16xbf16>
    %70 = vector.shape_cast %67 : vector<64x32xf32> to vector<4x16x32xf32>
    %71 = arith.truncf %70 : vector<4x16x32xf32> to vector<4x16x32xbf16>
    "tpu.trace_start"() <{level = 10 : i32, message = "hqk,hkd->hqd"}> : () -> ()
    %cst_20 = arith.constant dense<0.000000e+00> : vector<4x16x32xf32>
    %72 = tpu.matmul %69, %71, %cst_20 {dimension_numbers = #tpu.dot_dimension_numbers<[2], [1], [1], [2], [0, 0, 0, 1, 1, 2], [0], [0]>} : vector<4x16x16xbf16>, vector<4x16x32xbf16>, vector<4x16x32xf32> -> vector<4x16x32xf32>
    "tpu.trace_stop"() : () -> ()
    %cst_21 = arith.constant dense<0.000000e+00> : vector<16x32xf32>
    %73 = vector.multi_reduction <add>, %72, %cst_21 [0] : vector<4x16x32xf32> to vector<16x32xf32>
    %74 = arith.addf %0, %73 : vector<16x32xf32>
    %c0_22 = arith.constant 0 : index
    %c0_23 = arith.constant 0 : index
    %75 = vector.load %arg5[%c0_22, %c0_23] : memref<16x32xf32, #tpu.memory_space<vmem>>, vector<16x32xf32>
    tpu.vector_store %arg5[%c0_22, %c0_23], %74 {strides = array<i32>} : memref<16x32xf32, #tpu.memory_space<vmem>>, vector<16x32xf32>,
    return
  }
}

</mosaic_0001>

<bundles_post_ra>
// kernel: t5_layer_cross_attention.1
= control target key start
LH: loop header
LB: loop body
LE: loop exit
PB: predicated region body
PF: predicated region fallthrough
CT: control target
= control target key end

     0   :  { %10 = vsyncpa [#allocation3], 0  ;;  %s1345_s0 = inlined_call_operand.hbm [shape: f32[16,32], index: 0, kind: input, shape index: {}]   ;;  %s1346_s1 = inlined_call_operand.hbm [shape: f32[16,32], index: 1, kind: input, shape index: {}]   ;;  %s1347_s2 = inlined_call_operand.vmem [shape: f32[1,32], index: 2, kind: input, shape index: {}]   ;;  %s1348_s3 = inlined_call_operand.vmem [shape: bf16[32,96], index: 3, kind: input, shape index: {}]   ;;  %s1349_s4 = inlined_call_operand.hbm [shape: bf16[32,32], index: 4, kind: input, shape index: {}]   ;;  %s1350_s5 = inlined_call_operand.hbm [shape: f32[16,32], index: 5, kind: output, shape index: {}]  }
   0x1   :  { %11 = vsyncpa [#allocation6], 0 }
   0x2   :  { %12 = vsyncpa [#allocation4], 0  ;;  %s1025_s18 = smov [#allocation5]   ;;  %s1026_s20 = smov [#allocation2]  }
   0x3   :  { %s30_s19 = sshll.u32 %s1025_s18, 4  ;;  %s18_s21 = sshll.u32 %s1026_s20, 4  ;;  %s31_s19 = int_to_ptr.vmem [resolvable:$true] %s30_s19  ;;  %s1066_s21 = int_to_ptr.vmem [resolvable:$true] %s18_s21 }
   0x4   :  { %s931_s24 = scalar_lea.hbm %s1346_s1, 256 }
   0x5   :  { %p932_p0 = scmp.ne.s32.totalorder %s1346_s1, %s931_s24  ;;  %p935_p1 = scmp.lt.u32.totalorder %s931_s24, %s1346_s1 }
   0x7   :  { %p937_p2 = pnand %p935_p1, %p932_p0 }
   0x9   :  { %940 = shalt.err (!%p937_p2)
}
   0xa   :  { %s941_s29 = scalar_lea.vmem %s31_s19, 256  ;;  %p946_p4 = scmp.lt.s32.totalorder %s31_s19, %s31_s19 }
   0xb   :  { %p942_p3 = scmp.ne.s32.totalorder %s31_s19, %s941_s29  ;;  %p947_p5 = scmp.lt.s32.totalorder %s941_s29, %s941_s29 }
   0xd   :  { %p948_p6 = por %p947_p5, %p946_p4 }
   0xf   :  { %p949_p7 = pnand %p948_p6, %p942_p3 }
  0x11   :  { %952 = shalt.err (!%p949_p7)
}
  0x12   :  { %s1027_s30 = smov 128   ;;  %s1028_s6 = smov 8  }
  0x13   :  { %36 = dma.hbm_to_vmem [thread:$0]  %s1346_s1, 256, %s31_s19, [#allocation6], %s1027_s30, %s1027_s30, %s1028_s6  }
  0x14   :  { %s953_s11 = scalar_lea.hbm %s1345_s0, 256 }
  0x15   :  { %p954_p8 = scmp.ne.s32.totalorder %s1345_s0, %s953_s11  ;;  %p957_p9 = scmp.lt.u32.totalorder %s953_s11, %s1345_s0 }
  0x17   :  { %p959_p10 = pnand %p957_p9, %p954_p8 }
  0x19   :  { %962 = shalt.err (!%p959_p10)
}
  0x1a   :  { %s963_s16 = scalar_lea.vmem %s1066_s21, 256  ;;  %p968_p12 = scmp.lt.s32.totalorder %s1066_s21, %s1066_s21 }
  0x1b   :  { %p964_p11 = scmp.ne.s32.totalorder %s1066_s21, %s963_s16  ;;  %p969_p13 = scmp.lt.s32.totalorder %s963_s16, %s963_s16 }
  0x1d   :  { %p970_p0 = por %p969_p13, %p968_p12 }
  0x1f   :  { %p971_p1 = pnand %p970_p0, %p964_p11 }
  0x21   :  { %974 = shalt.err (!%p971_p1)
}
  0x22   :  { %24 = dma.hbm_to_vmem [thread:$0]  %s1345_s0, 256, %s1066_s21, [#allocation3], %s1027_s30, %s1027_s30, %s1028_s6  }
  0x23   :  { %s1029_s18 = smov [#allocation7]   ;;  %s975_s23 = scalar_lea.hbm %s1349_s4, 256 }
  0x24   :  { %s46_s19 = sshll.u32 %s1029_s18, 4  ;;  %p976_p2 = scmp.ne.s32.totalorder %s1349_s4, %s975_s23  ;;  %s47_s19 = int_to_ptr.vmem [resolvable:$true] %s46_s19 }
  0x25   :  { %p979_p3 = scmp.lt.u32.totalorder %s975_s23, %s1349_s4 }
  0x27   :  { %p981_p4 = pnand %p979_p3, %p976_p2 }
  0x29   :  { %984 = shalt.err (!%p981_p4)
}
  0x2a   :  { %s985_s28 = scalar_lea.vmem %s47_s19, 256  ;;  %p990_p6 = scmp.lt.s32.totalorder %s47_s19, %s47_s19 }
  0x2b   :  { %p986_p5 = scmp.ne.s32.totalorder %s47_s19, %s985_s28  ;;  %p991_p7 = scmp.lt.s32.totalorder %s985_s28, %s985_s28 }
  0x2d   :  { %p992_p8 = por %p991_p7, %p990_p6 }
  0x2f   :  { %p993_p9 = pnand %p992_p8, %p986_p5 }
  0x31   :  { %996 = shalt.err (!%p993_p9)
}
  0x32   :  { %s1030_s0 = smov 64   ;;  %s1031_s21 = smov 4  }
  0x33   :  { %52 = dma.hbm_to_vmem [thread:$0]  %s1349_s4, 256, %s47_s19, [#allocation6], %s1030_s0, %s1030_s0, %s1031_s21  }
  0x34   :  { %1019 = dma.done.wait [#allocation3], 256  }
  0x35   :  { %1020 = vsyncadd [#allocation3], 4294967040 }
  0x36   :  { %1021 = dma.done.wait [#allocation6], 512  }
  0x37   :  { %1022 = vsyncadd [#allocation6], 4294966784  ;;  %v1117_v0 = vld [vmem:[#allocation2] sm:$0xff]  ;;  %vm70_vm0 = vcmask 261120   ;;  %v1119_v1 = vld [vmem:[#allocation2 + $0x8] sm:$0xff]  ;;  %v167_v8 = vlaneseq  ;;  %v1032_v11 = vmov 0.0  }
  0x38   :  { %v68_v2 = vmul.f32 %v1117_v0, %v1117_v0  ;;  %v69_v3 = vmul.f32 %v1119_v1, %v1119_v1  ;;  %v891_v6 = vld [vmem:[%s1348_s3] sm:$0xff]   ;;  %v892_v7 = vld [vmem:[%s1348_s3 + $0x8] sm:$0xff]   ;;  %v65_v26 = vld [vmem:[#allocation5] sm:$0xff]  ;;  %vm343_vm6 = vcmask 130048   ;;  %vm1034_vm14 = vmmov 0   ;;  %s1035_s12 = smov [#allocation8]  }
  0x39   :  { %815 = vmatprep.subr.bf16.mxu0 %v891_v6  ;;  %v168_v9 = vand.u32 127, %v167_v8  ;;  %v769_v24 = vld [vmem:[%s1347_s2] ss:$0 sm:$0xff]  ;;  %v66_v27 = vld [vmem:[#allocation5 + $0x8] sm:$0xff]  ;;  %s1033_s2 = smov 96   ;;  %v894_v62 = vld [vmem:[#allocation7 + $0x8] sm:$0xff]  }
  0x3a   :  { %v71_v4 = vsel %vm70_vm0, %v68_v2, 0.0  ;;  %v74_v5 = vsel %vm70_vm0, %v69_v3, 0.0  ;;  %816 = vmatpush3.bf16.msra.mxu0 %v891_v6  ;;  %v95_v30 = vpack.c.bf16 %v66_v27, %v65_v26  ;;  %v893_v61 = vld [vmem:[#allocation7] sm:$0xff]   ;;  %s756_s13 = sshll.u32 %s1035_s12, 4  ;;  %s757_s13 = int_to_ptr.vmem [resolvable:$true] %s756_s13 }
  0x3b   :  { %72 = vadd.xlane.f32.xlu0 %v71_v4  ;;  %817 = vmatprep.subr.bf16.mxu0 %v892_v7  ;;  %v1134_v10 = vshra.s32 %v168_v9, 3  ;;  %s997_s14 = scalar_lea.vmem %s757_s13, 256  ;;  %p1002_p11 = scmp.lt.s32.totalorder %s757_s13, %s757_s13 }
  0x3c   :  { %p998_p10 = scmp.ne.s32.totalorder %s757_s13, %s997_s14  ;;  %p1003_p12 = scmp.lt.s32.totalorder %s997_s14, %s997_s14 }
  0x3d   :  { %vm172_vm1 = vcmp.eq.s32.totalorder %v1134_v10, 2  ;;  %vm173_vm2 = vcmp.eq.s32.totalorder %v1134_v10, 3  ;;  %vm170_vm3 = vcmp.eq.s32.totalorder %v1134_v10, 0  ;;  %vm171_vm4 = vcmp.eq.s32.totalorder %v1134_v10, 1 }
  0x3e   :  { %818 = vmatpush3.bf16.msra.mxu0 %v892_v7  ;;  %v776_v12 = vsel %vm172_vm1, 1.0, %v1032_v11  ;;  %v777_v13 = vsel %vm173_vm2, 1.0, %v1032_v11  ;;  %v774_v35 = vsel %vm170_vm3, 1.0, %v1032_v11  ;;  %v775_v37 = vsel %vm171_vm4, 1.0, %v1032_v11  ;;  %p1004_p13 = por %p1003_p12, %p1002_p11 }
  0x3f   :  { %75 = vadd.xlane.f32.xlu0 %v74_v5  ;;  %v886_v14 = vpack.i.bf16 %v777_v13, %v776_v12  ;;  %v881_v54 = vpack.i.bf16 %v775_v37, %v774_v35  ;;  %833 = vmatprep.subr.bf16.mxu0 %v893_v61 }
  0x40   :  { %p1005_p0 = pnand %p1004_p13, %p998_p10 }
  0x55   :  { %887 = vrot.lane.b32.xlu0 %v886_v14, %s1030_s0 }
  0xc8   :  { %v73_v15 = vpop.xlane.xlu0 %72 }
  0xc9   :  { %v78_v16 = vmul.f32 0.03125, %v73_v15 }
  0xcb   :  { %v80_v17 = vadd.f32 1e-06, %v78_v16 }
  0xcc   :  { %v76_v18 = vpop.xlane.xlu0 %75 }
  0xcd   :  { %895 = vrsqrt.f32 %v80_v17  ;;  %v79_v19 = vmul.f32 0.03125, %v76_v18 }
  0xcf   :  { %v81_v20 = vadd.f32 1e-06, %v79_v19  ;;  %v303_v19 = vshrl.u32 %v167_v8, 7 }
  0xd0   :  { %v888_v32 = vpop.permute.xlu0 %887 }
  0xd1   :  { %897 = vrsqrt.f32 %v81_v20  ;;  %v889_v33 = vunpack.i.l.bf16 %v888_v32  ;;  %v890_v34 = vunpack.i.h.bf16 %v888_v32  ;;  %v304_v20 = vadd.s32 8, %v303_v19 }
  0xd2   :  { %v309_v32 = vadd.s32 48, %v303_v19 }
  0xd7   :  { %v896_v21 = vpop.eup %895 }
  0xd8   :  { %v84_v22 = vmul.f32 %v896_v21, %v1117_v0  ;;  %v305_v21 = vadd.s32 16, %v303_v19 }
  0xda   :  { %v92_v28 = vmul.f32 %v769_v24, %v84_v22  ;;  %v311_v22 = vand.u32 15, %v303_v19 }
  0xdb   :  { %v898_v23 = vpop.eup %897 }
  0xdc   :  { %v85_v25 = vmul.f32 %v898_v23, %v1119_v1  ;;  %v306_v23 = vadd.s32 24, %v303_v19  ;;  %v1170_v26 = vshra.s32 %v311_v22, 3 }
  0xde   :  { %v93_v29 = vmul.f32 %v769_v24, %v85_v25  ;;  %v312_v24 = vand.u32 15, %v304_v20  ;;  %v313_v25 = vand.u32 15, %v305_v21  ;;  %v314_v27 = vand.u32 15, %v306_v23 }
  0xdf   :  { %vm327_vm5 = vcmp.eq.s32.totalorder %v1170_v26, %v1134_v10 }
  0xe0   :  { %v94_v31 = vpack.c.bf16 %v93_v29, %v92_v28  ;;  %v307_v28 = vadd.s32 32, %v303_v19  ;;  %v1172_v29 = vshra.s32 %v312_v24, 3  ;;  %v1178_v8 = vshra.s32 %v314_v27, 3 }
  0xe2   :  { %819 = vmatprep.mubr.msk.bf16.mxu0 %vm70_vm0, %v94_v31  ;;  %v308_v31 = vadd.s32 40, %v303_v19  ;;  %vm328_vm7 = vcmp.eq.s32.totalorder %v1172_v29, %v1134_v10  ;;  %vm330_vm9 = vcmp.eq.s32.totalorder %v1178_v8, %v1134_v10 }
  0xe3   :  { %820 = vmatmul.mubr.msk.bf16.vlgmr.msra.gmra.mrb[0].mxu0 %vm70_vm0, %v95_v30  ;;  %v1174_v30 = vshra.s32 %v313_v25, 3 }
  0xe4   :  { %834 = vmatpush3.bf16.msra.mxu0 %v893_v61 }
  0xe5   :  { %835 = vmatprep.subr.bf16.mxu0 %v894_v62  ;;  %vm329_vm8 = vcmp.eq.s32.totalorder %v1174_v30, %v1134_v10 }
  0xe8   :  { %836 = vmatpush3.bf16.msra.mxu0 %v894_v62 }
  0xe9   :  { %851 = vmatprep.subr.bf16.mxu0 %v1032_v11 }
 0x1b6   :  { %v821_v36 = vpop.f32.mrb[0].mxu0 }
 0x1b7   :  { %v152_v38 = vpop.f32.mrb[1].mxu0  ;;  %v210_v39 = vmul.f32 %v889_v33, %v821_v36  ;;  %v212_v44 = vmul.f32 %v890_v34, %v821_v36 }
 0x1b8   :  { %v186_v40 = vmul.f32 %v776_v12, %v152_v38  ;;  %v188_v41 = vmul.f32 %v777_v13, %v152_v38  ;;  %v822_v42 = vpop.f32.mrb[2].mxu0  ;;  %v182_v43 = vmul.f32 %v774_v35, %v152_v38  ;;  %v184_v47 = vmul.f32 %v775_v37, %v152_v38 }
 0x1b9   :  { %v155_v45 = vpop.f32.mrb[3].mxu0  ;;  %v218_v46 = vpack.c.bf16 %v822_v42, %v821_v36  ;;  %v211_v48 = vmul.f32 %v889_v33, %v822_v42  ;;  %v213_v49 = vmul.f32 %v890_v34, %v822_v42  ;;  %v315_v33 = vand.u32 15, %v307_v28 }
 0x1ba   :  { %v187_v50 = vmul.f32 %v776_v12, %v155_v45  ;;  %v189_v51 = vmul.f32 %v777_v13, %v155_v45  ;;  %v183_v52 = vmul.f32 %v774_v35, %v155_v45  ;;  %v185_v53 = vmul.f32 %v775_v37, %v155_v45 }
 0x1bb   :  { %220 = vrot.lane.b32.xlu1 %v218_v46, %s1033_s2  ;;  %v442_v55 = vpack.c.bf16 %v211_v48, %v210_v39  ;;  %v443_v56 = vpack.c.bf16 %v213_v49, %v212_v44  ;;  %v310_v34 = vadd.s32 56, %v303_v19  ;;  %v316_v37 = vand.u32 15, %v308_v31 }
 0x1bc   :  { %v214_v57 = vpack.c.bf16 %v183_v52, %v182_v43  ;;  %v215_v58 = vpack.c.bf16 %v185_v53, %v184_v47  ;;  %v216_v59 = vpack.c.bf16 %v187_v50, %v186_v40  ;;  %v217_v60 = vpack.c.bf16 %v189_v51, %v188_v41 }
 0x1bd   :  { %v317_v38 = vand.u32 15, %v309_v32  ;;  %v1197_v43 = vshra.s32 %v315_v33, 3  ;;  %v318_v44 = vand.u32 15, %v310_v34  ;;  %v1207_v48 = vshra.s32 %v316_v37, 3 }
 0x1be   :  { %825 = vmatprep.mubr.msk.bf16.mxu1 %vm70_vm0, %v214_v57 }
 0x1bf   :  { %882 = vrot.lane.b32.xlu1 %v881_v54, %s1030_s0  ;;  %v1209_v49 = vshra.s32 %v317_v38, 3  ;;  %vm331_vm10 = vcmp.eq.s32.totalorder %v1197_v43, %v1134_v10  ;;  %v1218_v52 = vshra.s32 %v318_v44, 3  ;;  %vm332_vm11 = vcmp.eq.s32.totalorder %v1207_v48, %v1134_v10 }
 0x1c1   :  { %vm333_vm12 = vcmp.eq.s32.totalorder %v1209_v49, %v1134_v10  ;;  %vm334_vm13 = vcmp.eq.s32.totalorder %v1218_v52, %v1134_v10 }
 0x22d   :  { %v221_v63 = vpop.permute.xlu1 %220 }
 0x22e   :  { %869 = vmatprep.subr.msk.bf16.mxu1 %vm70_vm0, %v221_v63  ;;  %v235_v2 = vsel %vm70_vm0, %v221_v63, 0 }
 0x22f   :  { %824 = vmatpush3.bf16.xpose.msra.mxu1 %v235_v2 }
 0x230   :  { %845 = vmatprep.subr.bf16.mxu1 %v1032_v11 }
 0x231   :  { %v883_v3 = vpop.permute.xlu1 %882 }
 0x232   :  { %v885_v4 = vunpack.i.h.bf16 %v883_v3  ;;  %v884_v5 = vunpack.i.l.bf16 %v883_v3 }
 0x234   :  { %v206_v6 = vmul.f32 %v884_v5, %v821_v36  ;;  %v207_v7 = vmul.f32 %v884_v5, %v822_v42  ;;  %v208_v9 = vmul.f32 %v885_v4, %v821_v36  ;;  %v209_v12 = vmul.f32 %v885_v4, %v822_v42 }
 0x236   :  { %826 = vmatmul.mubr.msk.bf16.vlgmr.msra.gmra.mrb[0].mxu1 %vm70_vm0, %v215_v58  ;;  %v440_v13 = vpack.c.bf16 %v207_v7, %v206_v6  ;;  %v441_v14 = vpack.c.bf16 %v209_v12, %v208_v9 }
 0x237   :  { %829 = vmatprep.mubr.msk.bf16.mxu1 %vm70_vm0, %v216_v59 }
 0x238   :  { %452 = vrot.lane.b32.xlu1 %v440_v13, %s1030_s0 }
 0x23c   :  { %454 = vrot.lane.b32.xlu1 %v441_v14, %s1030_s0 }
 0x23e   :  { %830 = vmatmul.mubr.msk.bf16.gmra.mrb[4].mxu1 %vm70_vm0, %v217_v60 }
 0x23f   :  { %847 = vmatprep.mubr.msk.bf16.mxu1 %vm1034_vm14, %v1032_v11 }
 0x240   :  { %456 = vrot.lane.b32.xlu1 %v442_v55, %s1030_s0 }
 0x244   :  { %458 = vrot.lane.b32.xlu1 %v443_v56, %s1030_s0 }
 0x2aa   :  { %v453_v15 = vpop.permute.xlu1 %452 }
 0x2ab   :  { %837 = vmatprep.mubr.msk.bf16.mxu0 %vm70_vm0, %v453_v15 }
 0x2ae   :  { %v455_v16 = vpop.permute.xlu1 %454 }
 0x2af   :  { %838 = vmatmul.mubr.msk.bf16.vlgmr.msra.gmra.mrb[4].mxu0 %vm70_vm0, %v455_v16 }
 0x2b2   :  { %v457_v17 = vpop.permute.xlu1 %456 }
 0x2b3   :  { %841 = vmatprep.mubr.msk.bf16.mxu0 %vm70_vm0, %v457_v17 }
 0x2b6   :  { %v459_v18 = vpop.permute.xlu1 %458 }
 0x2b7   :  { %842 = vmatmul.mubr.msk.bf16.gmra.mrb[8].mxu0 %vm70_vm0, %v459_v18 }
 0x2b8   :  { %853 = vmatprep.mubr.msk.bf16.mxu0 %vm1034_vm14, %v1032_v11 }
 0x309   :  { %v1180_v35 = vpop.f32.mrb[0].mxu1 }
 0x30a   :  { %v1182_v36 = vpop.f32.mrb[1].mxu1  ;;  %v337_v46 = vsel %vm329_vm8, %v1180_v35, -inf }
 0x30b   :  { %v1188_v39 = vpop.f32.mrb[2].mxu1  ;;  %v335_v40 = vsel %vm327_vm5, %v1182_v36, -inf  ;;  %v350_v51 = vsel %vm343_vm6, %v337_v46, -inf }
 0x30c   :  { %v274_v41 = vpop.f32.mrb[3].mxu1  ;;  %v344_v42 = vsel %vm343_vm6, %v335_v40, -inf  ;;  %v338_v50 = vsel %vm330_vm9, %v1188_v39, -inf }
 0x30d   :  { %345 = vmax.xlane.f32.xlu1 %v344_v42  ;;  %v336_v45 = vsel %vm328_vm7, %v274_v41, -inf  ;;  %v353_v55 = vsel %vm343_vm6, %v338_v50, -inf }
 0x30e   :  { %v347_v47 = vsel %vm343_vm6, %v336_v45, -inf }
 0x30f   :  { %348 = vmax.xlane.f32.xlu0 %v347_v47 }
 0x311   :  { %v1220_v53 = vpop.f32.mrb[4].mxu1  ;;  %351 = vmax.xlane.f32.xlu1 %v350_v51 }
 0x312   :  { %v287_v54 = vpop.f32.mrb[5].mxu1  ;;  %v341_v61 = vsel %vm333_vm12, %v1220_v53, -inf }
 0x313   :  { %354 = vmax.xlane.f32.xlu0 %v353_v55  ;;  %v1227_v56 = vpop.f32.mrb[6].mxu1  ;;  %v339_v57 = vsel %vm331_vm10, %v287_v54, -inf  ;;  %v362_v2 = vsel %vm343_vm6, %v341_v61, -inf }
 0x314   :  { %v290_v58 = vpop.f32.mrb[7].mxu1  ;;  %v356_v59 = vsel %vm343_vm6, %v339_v57, -inf  ;;  %v342_v63 = vsel %vm334_vm13, %v1227_v56, -inf }
 0x315   :  { %357 = vmax.xlane.f32.xlu1 %v356_v59  ;;  %v340_v60 = vsel %vm332_vm11, %v290_v58, -inf  ;;  %v365_v3 = vsel %vm343_vm6, %v342_v63, -inf }
 0x316   :  { %v359_v62 = vsel %vm343_vm6, %v340_v60, -inf }
 0x317   :  { %360 = vmax.xlane.f32.xlu0 %v359_v62 }
 0x319   :  { %363 = vmax.xlane.f32.xlu1 %v362_v2 }
 0x31b   :  { %366 = vmax.xlane.f32.xlu0 %v365_v3 }
 0x382   :  { %v839_v4 = vpop.f32.mrb[4].mxu0 }
 0x383   :  { %v518_v5 = vpop.f32.mrb[5].mxu0 }
 0x384   :  { %v840_v6 = vpop.f32.mrb[6].mxu0 }
 0x385   :  { %v554_v7 = vpack.c.bf16 %v840_v6, %v839_v4  ;;  %v521_v9 = vpop.f32.mrb[7].mxu0 }
 0x386   :  { %v553_v12 = vpack.c.bf16 %v521_v9, %v518_v5 }
 0x387   :  { %852 = vmatpush3.bf16.msra.mxu0 %v554_v7 }
 0x388   :  { %846 = vmatpush3.bf16.msra.mxu1 %v553_v12  ;;  %863 = vmatprep.subr.bf16.mxu0 %v1032_v11 }
 0x389   :  { %857 = vmatprep.subr.bf16.mxu1 %v1032_v11 }
 0x38a   :  { %v1251_v13 = vpop.f32.mrb[8].mxu0 }
 0x38b   :  { %v1253_v14 = vpop.f32.mrb[9].mxu0 }
 0x38c   :  { %v1255_v15 = vpop.f32.mrb[10].mxu0 }
 0x38d   :  { %v556_v16 = vpack.c.bf16 %v1255_v15, %v1251_v13  ;;  %v1259_v17 = vpop.f32.mrb[11].mxu0 }
 0x38e   :  { %v555_v18 = vpack.c.bf16 %v1259_v17, %v1253_v14 }
 0x39a   :  { %v346_v19 = vpop.xlane.xlu1 %345 }
 0x39b   :  { %v368_v20 = vsub.f32 %v1182_v36, %v346_v19 }
 0x39c   :  { %v349_v21 = vpop.xlane.xlu0 %348 }
 0x39d   :  { %v376_v22 = vmul.f32 1.442695, %v368_v20  ;;  %v369_v23 = vsub.f32 %v274_v41, %v349_v21 }
 0x39e   :  { %v352_v24 = vpop.xlane.xlu1 %351 }
 0x39f   :  { %899 = vpow2.f32 %v376_v22  ;;  %v378_v25 = vmul.f32 1.442695, %v369_v23  ;;  %v370_v27 = vsub.f32 %v1180_v35, %v352_v24 }
 0x3a0   :  { %v355_v28 = vpop.xlane.xlu0 %354 }
 0x3a1   :  { %901 = vpow2.f32 %v378_v25  ;;  %v380_v31 = vmul.f32 1.442695, %v370_v27  ;;  %v371_v32 = vsub.f32 %v1188_v39, %v355_v28 }
 0x3a2   :  { %v358_v33 = vpop.xlane.xlu1 %357 }
 0x3a3   :  { %903 = vpow2.f32 %v380_v31  ;;  %v382_v34 = vmul.f32 1.442695, %v371_v32  ;;  %v372_v37 = vsub.f32 %v287_v54, %v358_v33 }
 0x3a4   :  { %v361_v38 = vpop.xlane.xlu0 %360 }
 0x3a5   :  { %905 = vpow2.f32 %v382_v34  ;;  %v384_v36 = vmul.f32 1.442695, %v372_v37  ;;  %v373_v40 = vsub.f32 %v290_v58, %v361_v38 }
 0x3a6   :  { %v364_v42 = vpop.xlane.xlu1 %363 }
 0x3a7   :  { %907 = vpow2.f32 %v384_v36  ;;  %v386_v41 = vmul.f32 1.442695, %v373_v40  ;;  %v374_v44 = vsub.f32 %v1220_v53, %v364_v42 }
 0x3a8   :  { %v367_v45 = vpop.xlane.xlu0 %366 }
 0x3a9   :  { %v900_v35 = vpop.eup %899  ;;  %909 = vpow2.f32 %v386_v41  ;;  %v388_v46 = vmul.f32 1.442695, %v374_v44  ;;  %v375_v47 = vsub.f32 %v1227_v56, %v367_v45 }
 0x3aa   :  { %v392_v39 = vsel %vm327_vm5, %v900_v35, 0.0 }
 0x3ab   :  { %v902_v50 = vpop.eup %901  ;;  %911 = vpow2.f32 %v388_v46  ;;  %v390_v51 = vmul.f32 1.442695, %v375_v47  ;;  %v400_v54 = vsel %vm343_vm6, %v392_v39, 0.0 }
 0x3ac   :  { %401 = vadd.xlane.f32.xlu1 %v400_v54  ;;  %v393_v53 = vsel %vm328_vm7, %v902_v50, 0.0 }
 0x3ad   :  { %v904_v55 = vpop.eup %903  ;;  %913 = vpow2.f32 %v390_v51  ;;  %v403_v57 = vsel %vm343_vm6, %v393_v53, 0.0 }
 0x3ae   :  { %404 = vadd.xlane.f32.xlu0 %v403_v57  ;;  %v394_v26 = vsel %vm329_vm8, %v904_v55, 0.0 }
 0x3af   :  { %v906_v56 = vpop.eup %905  ;;  %v406_v58 = vsel %vm343_vm6, %v394_v26, 0.0 }
 0x3b0   :  { %407 = vadd.xlane.f32.xlu1 %v406_v58  ;;  %v395_v59 = vsel %vm330_vm9, %v906_v56, 0.0 }
 0x3b1   :  { %v908_v60 = vpop.eup %907  ;;  %v409_v29 = vsel %vm343_vm6, %v395_v59, 0.0 }
 0x3b2   :  { %410 = vadd.xlane.f32.xlu0 %v409_v29  ;;  %v396_v61 = vsel %vm331_vm10, %v908_v60, 0.0 }
 0x3b3   :  { %v910_v62 = vpop.eup %909  ;;  %v412_v30 = vsel %vm343_vm6, %v396_v61, 0.0 }
 0x3b4   :  { %413 = vadd.xlane.f32.xlu1 %v412_v30  ;;  %v397_v63 = vsel %vm332_vm11, %v910_v62, 0.0 }
 0x3b5   :  { %v912_v2 = vpop.eup %911  ;;  %v415_v8 = vsel %vm343_vm6, %v397_v63, 0.0 }
 0x3b6   :  { %416 = vadd.xlane.f32.xlu0 %v415_v8  ;;  %v398_v3 = vsel %vm333_vm12, %v912_v2, 0.0 }
 0x3b7   :  { %v914_v4 = vpop.eup %913  ;;  %v418_v43 = vsel %vm343_vm6, %v398_v3, 0.0 }
 0x3b8   :  { %419 = vadd.xlane.f32.xlu1 %v418_v43  ;;  %v399_v5 = vsel %vm334_vm13, %v914_v4, 0.0 }
 0x3b9   :  { %v421_v6 = vsel %vm343_vm6, %v399_v5, 0.0 }
 0x3ba   :  { %422 = vadd.xlane.f32.xlu0 %v421_v6 }
 0x439   :  { %v402_v48 = vpop.xlane.xlu1 %401 }
 0x43a   :  { %915 = vrcp.f32 %v402_v48 }
 0x43b   :  { %v405_v49 = vpop.xlane.xlu0 %404 }
 0x43c   :  { %917 = vrcp.f32 %v405_v49 }
 0x43d   :  { %v408_v7 = vpop.xlane.xlu1 %407 }
 0x43e   :  { %919 = vrcp.f32 %v408_v7 }
 0x43f   :  { %v411_v9 = vpop.xlane.xlu0 %410 }
 0x440   :  { %921 = vrcp.f32 %v411_v9 }
 0x441   :  { %v414_v10 = vpop.xlane.xlu1 %413 }
 0x442   :  { %923 = vrcp.f32 %v414_v10 }
 0x443   :  { %v417_v52 = vpop.xlane.xlu0 %416 }
 0x444   :  { %v916_v12 = vpop.eup %915  ;;  %925 = vrcp.f32 %v417_v52 }
 0x445   :  { %v420_v19 = vpop.xlane.xlu1 %419  ;;  %v432_v21 = vmul.f32 %v916_v12, %v392_v39 }
 0x446   :  { %v918_v20 = vpop.eup %917  ;;  %927 = vrcp.f32 %v420_v19 }
 0x447   :  { %v433_v22 = vmul.f32 %v918_v20, %v393_v53  ;;  %v423_v23 = vpop.xlane.xlu0 %422 }
 0x448   :  { %v920_v24 = vpop.eup %919  ;;  %929 = vrcp.f32 %v423_v23 }
 0x449   :  { %v549_v25 = vpack.c.bf16 %v433_v22, %v432_v21  ;;  %v434_v28 = vmul.f32 %v920_v24, %v394_v26 }
 0x44a   :  { %v922_v27 = vpop.eup %921 }
 0x44b   :  { %v435_v31 = vmul.f32 %v922_v27, %v395_v59  ;;  %848 = vmatmul.mubr.msk.bf16.vlgmr.msra.gmra.mrb[8].mxu1 %vm343_vm6, %v549_v25 }
 0x44c   :  { %v924_v32 = vpop.eup %923  ;;  %858 = vmatpush3.bf16.msra.mxu1 %v555_v18  ;;  %859 = vmatprep.mubr.msk.bf16.mxu1 %vm1034_vm14, %v1032_v11 }
 0x44d   :  { %v550_v33 = vpack.c.bf16 %v435_v31, %v434_v28  ;;  %v436_v37 = vmul.f32 %v924_v32, %v396_v61 }
 0x44e   :  { %v926_v34 = vpop.eup %925 }
 0x44f   :  { %v437_v38 = vmul.f32 %v926_v34, %v397_v63  ;;  %854 = vmatmul.mubr.msk.bf16.vlgmr.msra.gmra.mrb[12].mxu0 %vm343_vm6, %v550_v33 }
 0x450   :  { %v928_v36 = vpop.eup %927  ;;  %864 = vmatpush3.bf16.msra.mxu0 %v556_v16  ;;  %865 = vmatprep.mubr.msk.bf16.mxu0 %vm1034_vm14, %v1032_v11 }
 0x451   :  { %v551_v40 = vpack.c.bf16 %v437_v38, %v436_v37  ;;  %v438_v17 = vmul.f32 %v928_v36, %v398_v3 }
 0x452   :  { %v930_v14 = vpop.eup %929 }
 0x453   :  { %v439_v18 = vmul.f32 %v930_v14, %v399_v5  ;;  %860 = vmatmul.mubr.msk.bf16.vlgmr.msra.gmra.mrb[12].mxu1 %vm343_vm6, %v551_v40 }
 0x455   :  { %v552_v42 = vpack.c.bf16 %v439_v18, %v438_v17 }
 0x457   :  { %866 = vmatmul.mubr.msk.bf16.vlgmr.msra.gmra.mrb[16].mxu0 %vm343_vm6, %v552_v42 }
 0x51e   :  { %v594_v41 = vpop.f32.mrb[8].mxu1 }
 0x51f   :  { %v849_v44 = vpop.f32.mrb[9].mxu1  ;;  %v733_v13 = vsel %vm70_vm0, %v594_v41, 0.0 }
 0x520   :  { %v597_v45 = vpop.f32.mrb[10].mxu1 }
 0x521   :  { %v850_v35 = vpop.f32.mrb[11].mxu1  ;;  %v740_v39 = vsel %vm70_vm0, %v597_v45, 0.0 }
 0x522   :  { %v638_v46 = vpop.f32.mrb[12].mxu0 }
 0x523   :  { %v734_v15 = vsel %vm70_vm0, %v638_v46, 0.0  ;;  %v855_v16 = vpop.f32.mrb[13].mxu0 }
 0x524   :  { %v735_v11 = vadd.f32 %v734_v15, %v733_v13  ;;  %v641_v47 = vpop.f32.mrb[14].mxu0 }
 0x525   :  { %v741_v50 = vsel %vm70_vm0, %v641_v47, 0.0  ;;  %v856_v51 = vpop.f32.mrb[15].mxu0 }
 0x526   :  { %v742_v54 = vadd.f32 %v741_v50, %v740_v39  ;;  %v682_v53 = vpop.f32.mrb[12].mxu1 }
 0x527   :  { %v736_v55 = vsel %vm70_vm0, %v682_v53, 0.0  ;;  %v861_v57 = vpop.f32.mrb[13].mxu1 }
 0x528   :  { %v737_v26 = vadd.f32 %v736_v55, %v735_v11  ;;  %v685_v56 = vpop.f32.mrb[14].mxu1 }
 0x529   :  { %v743_v58 = vsel %vm70_vm0, %v685_v56, 0.0  ;;  %v862_v59 = vpop.f32.mrb[15].mxu1 }
 0x52a   :  { %v744_v60 = vadd.f32 %v743_v58, %v742_v54  ;;  %v726_v29 = vpop.f32.mrb[16].mxu0 }
 0x52b   :  { %v738_v61 = vsel %vm70_vm0, %v726_v29, 0.0  ;;  %v867_v62 = vpop.f32.mrb[17].mxu0 }
 0x52c   :  { %v739_v30 = vadd.f32 %v738_v61, %v737_v26  ;;  %v729_v63 = vpop.f32.mrb[18].mxu0 }
 0x52d   :  { %v745_v2 = vsel %vm70_vm0, %v729_v63, 0.0  ;;  %v868_v8 = vpop.f32.mrb[19].mxu0 }
 0x52e   :  { %v747_v3 = vadd.f32 %v739_v30, %v1117_v0  ;;  %v746_v4 = vadd.f32 %v745_v2, %v744_v60 }
 0x530   :  { %749 = vst.msk [vmem:[#allocation8] sm:$0xff] %vm70_vm0, %v747_v3  ;;  %v748_v43 = vadd.f32 %v746_v4, %v1119_v1 }
 0x532   :  { %750 = vst.msk [vmem:[#allocation8 + $0x8] sm:$0xff] %vm70_vm0, %v748_v43 }
 0x533   :  { %1008 = shalt.err (!%p1005_p0)
}
 0x534   :  { %s1009_s1 = scalar_lea.hbm %s1350_s5, 256 }
 0x535   :  { %p1010_p1 = scmp.ne.s32.totalorder %s1350_s5, %s1009_s1  ;;  %p1013_p2 = scmp.lt.u32.totalorder %s1009_s1, %s1350_s5 }
 0x537   :  { %p1015_p3 = pnand %p1013_p2, %p1010_p1 }
 0x539   :  { %1018 = shalt.err (!%p1015_p3)
}
 0x53a   :  { %762 = dma.vmem_to_hbm [thread:$0]  %s757_s13, 256, %s1350_s5, [#allocation4], %s1027_s30, %s1027_s30, %s1028_s6  }
 0x53b   :  { %1023 = dma.done.wait [#allocation4], 256  }
 0x53c   :  { %1024 = vsyncadd [#allocation4], 4294967040 }
 0x53d   :  { %766 = vsyncpa [#allocation3], 1 }
 0x53e   :  { %767 = vsyncpa [#allocation6], 1 }
 0x53f   :  { %768 = vsyncpa [#allocation4], 1 }

</bundles_post_ra>
